<compile_context>
chip_gen: v5e
topology: v5e:2x2
jax: 0.10.0
libtpu: 0.0.40
codegen_flags: <defaults>
</compile_context>

<pallas_src>
import functools
import numpy as np

import jax
import jax.numpy as jnp
from jax.experimental import pallas as pl
from jax.experimental.pallas import tpu as pltpu


# ----------------------------------------------------------------------------
# Pallas kernels
# ----------------------------------------------------------------------------

def _symmetric_quant_kernel(x_ref, o_ref, *, inv_scale, n):
    # SymmetricQuantAct.forward: round(x / scale + 0) clamped to [-n-1, n].
    # Input read in its native dtype and upcast in VMEM (no wrapper-side cast).
    x = x_ref[...].astype(jnp.float32)
    q = jnp.round(x * jnp.float32(inv_scale))        # round-half-to-even == torch.round
    o_ref[...] = jnp.clip(q, jnp.float32(-n - 1), jnp.float32(n)).astype(o_ref.dtype)


def _requant_fixed_point(x, nm, shifter):
    """integer_multiply_shift_round: RoundHalfAwayFromZero(x * nm / 2**shifter).

    x: int32 tensor; nm: python int in (0, 2**23]; shifter: python int >= 1.
    TPU vectors have no 64-bit ints, so the 64-bit product is emulated exactly
    with uint32 (hi, lo) pairs.  Exact whenever |result| <= 2**31 - 1 (always
    true for sane scales); larger magnitudes saturate to 2**30, which the final
    small [-r-1, r] clamp absorbs for activation_bit <= 31.
    Carry-outs of wrapping uint32 adds use the cheap compare (c < a).
    """
    neg = x < 0
    ax = jnp.where(neg, -x, x).astype(jnp.uint32)     # |x| (wraps OK for INT32_MIN)
    al = ax & jnp.uint32(0xFFFF)
    ah = ax >> 16
    nml = jnp.uint32(nm & 0xFFFF)
    nmh = jnp.uint32((nm >> 16) & 0xFFFF)

    # |x| * nm = p3*2^32 + (p1 + p2)*2^16 + p0
    p0 = al * nml
    p1 = al * nmh
    p2 = ah * nml
    p3 = ah * nmh
    mid = p1 + p2
    c_mid = (mid < p1).astype(jnp.uint32)             # carry of p1 + p2
    m16 = mid << 16
    lo = p0 + m16
    c_lo = (lo < p0).astype(jnp.uint32)               # carry of p0 + m16
    hi = p3 + (mid >> 16) + (c_mid << 16) + c_lo      # < 2**25, no overflow

    # add rounding bias 2**(shifter-1) (sr_round_na nudge; sign handled via `neg`)
    if shifter - 1 < 32:
        h_lo = jnp.uint32((1 << (shifter - 1)) & 0xFFFFFFFF)
        v_lo = lo + h_lo
        v_hi = hi + (v_lo < lo).astype(jnp.uint32)
    else:
        v_lo = lo
        v_hi = hi + jnp.uint32(1 << (shifter - 33))

    # unsigned 64-bit right shift by `shifter`
    if shifter < 32:
        q_lo = (v_lo >> shifter) | (v_hi << (32 - shifter))
        q_hi = v_hi >> shifter
    else:
        q_lo = v_hi >> (shifter - 32)
        q_hi = jnp.zeros_like(v_hi)

    # trimmed saturation: exact result whenever |result| < 2**31; anything
    # bigger saturates to 2**30, which the final clamp maps to the same value
    # the int64 reference would produce.
    sat = (q_hi | (q_lo >> 31)) != jnp.uint32(0)
    mag = jnp.where(sat, jnp.uint32(1 << 30), q_lo).astype(jnp.int32)
    return jnp.where(neg, -mag, mag)


def _fixedpoint_kernel(x_ref, o_ref, *, nm, shifter, r):
    q = _requant_fixed_point(x_ref[...].astype(jnp.int32), nm, shifter)
    o_ref[...] = jnp.clip(q, -r - 1, r).astype(o_ref.dtype)   # fused int8/int16 downcast


def _fixedpoint_identity_kernel(x_ref, id_ref, o_ref, *,
                                nm_x, shift_x, nm_id, shift_id, r):
    qx = _requant_fixed_point(x_ref[...].astype(jnp.int32), nm_x, shift_x)
    qi = _requant_fixed_point(id_ref[...].astype(jnp.int32), nm_id, shift_id)
    o_ref[...] = jnp.clip(qi + qx, -r - 1, r).astype(o_ref.dtype)


def _add_kernel(x_ref, y_ref, o_ref):
    o_ref[...] = (x_ref[...] + y_ref[...]).astype(o_ref.dtype)


# ----------------------------------------------------------------------------
# pallas_call wrapper (glue)
# ----------------------------------------------------------------------------

_VMEM_TILE_BUDGET = 8 * 1024 * 1024   # double-buffered tile bytes, all operands
_MAX_ROW_BLOCK = 1024                 # diminishing returns past ~512-1024 rows


def _as_2d(x):
    return x.reshape(-1, x.shape[-1])


def _sublane(dtype):
    # minimum sublane multiple: f32/i32 -> 8, i16/bf16 -> 16, i8 -> 32
    return max(8, 32 // np.dtype(dtype).itemsize)


def _elementwise_pallas(kernel, out_dtype, arrays):
    """Run an elementwise kernel over (rows, hidden) tiles, hidden on lanes."""
    flat = [_as_2d(a) for a in arrays]
    R, C = flat[0].shape
    dtypes = [a.dtype for a in flat] + [np.dtype(out_dtype)]
    sub = max(_sublane(d) for d in dtypes)
    bytes_per_row = sum(C * np.dtype(d).itemsize for d in dtypes)

    # Largest row block (multiple of the narrowest dtype's sublane tile) whose
    # double-buffered working set fits the conservative cross-generation budget.
    bm = min(_MAX_ROW_BLOCK, _VMEM_TILE_BUDGET // (2 * bytes_per_row), R)
    bm = (bm // sub) * sub
    if bm == 0:
        bm = R                       # tiny input: single full-array block (always legal)
    grid = (pl.cdiv(R, bm),)         # masked tail block if R % bm != 0 (elementwise-safe)

    spec = pl.BlockSpec((bm, C), lambda i: (i, 0))
    out = pl.pallas_call(
        kernel,
        out_shape=jax.ShapeDtypeStruct((R, C), out_dtype),
        grid=grid,
        in_specs=[pl.BlockSpec((bm, C), lambda i: (i, 0)) for _ in flat],
        out_specs=spec,
        compiler_params=pltpu.CompilerParams(
            dimension_semantics=("parallel",),     # shard row blocks on v7x dual-TC
            vmem_limit_bytes=32 << 20),            # headroom over v5e's 16 MiB default
    )(*flat)
    return out.reshape(arrays[0].shape)


def _symmetric_quant(x, inv_scale_f32, n):
    # inv_scale is host-computed numpy -> bake it in as a compile-time constant.
    kern = functools.partial(_symmetric_quant_kernel,
                             inv_scale=float(inv_scale_f32), n=n)
    return _elementwise_pallas(kern, jnp.float32, [x])


def _fixedpoint_requant(x, nm, shifter, r, out_dtype):
    kern = functools.partial(_fixedpoint_kernel, nm=nm, shifter=shifter, r=r)
    return _elementwise_pallas(kern, out_dtype, [x])


def _fixedpoint_requant_identity(x, identity, nm_x, shift_x, nm_id, shift_id, r,
                                 out_dtype):
    kern = functools.partial(_fixedpoint_identity_kernel, nm_x=nm_x, shift_x=shift_x,
                             nm_id=nm_id, shift_id=shift_id, r=r)
    return _elementwise_pallas(kern, out_dtype, [x, identity])


# ----------------------------------------------------------------------------
# Host-side scalar math (mirrors torch's scalar / .item() computations)
# ----------------------------------------------------------------------------

def _frexp_requant_params(pre_act_scaling_factor, z_scaling_factor, accuracy=23):
    """Host-side mirror of FixedPointMul's frexp/round (torch uses .item() here)."""
    a = np.float64(pre_act_scaling_factor)
    b = np.float64(np.float32(z_scaling_factor))
    m, e = np.frexp(a / b)
    nm = int(np.round(m * (2.0 ** accuracy)))         # fits in 24 bits
    shifter = accuracy - int(e)
    # TODO(synk): the `e - accuracy >= 0` left-shift branch of
    # integer_multiply_shift_round is not implemented (requires new_scale >= 2**22).
    assert shifter >= 1, "unsupported: e >= accuracy"
    return nm, shifter


def _symmetric_scale(activation_bit, x_min, x_max):
    """symmetric_linear_quantization_params (per-tensor), float32 math as in torch."""
    n = 2 ** (activation_bit - 1) - 1
    scale = np.maximum(np.abs(np.float32(x_min)), np.abs(np.float32(x_max)))
    scale = np.maximum(scale, np.float32(1e-8)) / np.float32(n)
    return np.float32(scale)


def _out_int_dtype(activation_bit):
    if activation_bit <= 8:
        return jnp.int8
    if activation_bit <= 16:
        return jnp.int16
    # TODO(synk): torch returns int64 for bit_num > 32; TPU vectors have no
    # int64, so bit_num in (16, 64] is emitted as int32.
    return jnp.int32


class QuantActPallas:
    """JAX/Pallas equivalent of QuantAct.forward (inference / eval mode)."""

    def __init__(self, activation_bit, act_range_momentum=0.95, per_channel=False,
                 channel_len=None, quant_mode=False):
        if per_channel:
            raise NotImplementedError(
                "per-channel mode is not currently supported for activation.")
        self.activation_bit = activation_bit
        self.act_range_momentum = act_range_momentum
        self.quant_mode = quant_mode
        self.per_channel = per_channel
        self.percentile = False
        # buffers, deterministic init exactly as in the torch __init__
        self.x_min = np.float32(-1e-5)
        self.x_max = np.float32(1e-5)
        self.act_scaling_factor = np.float32(0.0)

    def __call__(self, x, pre_act_scaling_factor=None, identity=None,
                 identity_scaling_factor=None, specified_min=None, specified_max=None):
        # TODO(synk): training-time running-min/max (momentum) buffer update is a
        # stateful calibration step; this implements the eval-mode forward.
        if not self.quant_mode:
            if identity is None:
                return x, None
            out_dtype = jnp.result_type(identity.dtype, x.dtype)
            return _elementwise_pallas(_add_kernel, out_dtype, [identity, x]), None

        x_min = self.x_min if specified_min is None else specified_min
        x_max = self.x_max if specified_max is None else specified_max
        n = 2 ** (self.activation_bit - 1) - 1
        self.act_scaling_factor = _symmetric_scale(self.activation_bit, x_min, x_max)

        if pre_act_scaling_factor is None:
            # SymmetricQuantAct path (note: the reference quantizes `x`, not x+identity)
            inv_scale = np.float32(1.0) / self.act_scaling_factor
            q = _symmetric_quant(x, inv_scale, n)               # float32, int-valued
        else:
            # FixedPointMul path (integer requantization, optional identity add);
            # the int8/int16 downcast is fused into the kernel.
            out_dtype = _out_int_dtype(self.activation_bit)
            nm_x, sh_x = _frexp_requant_params(pre_act_scaling_factor,
                                               self.act_scaling_factor)
            if identity is None:
                q = _fixedpoint_requant(x, nm_x, sh_x, n, out_dtype)
            else:
                nm_i, sh_i = _frexp_requant_params(identity_scaling_factor,
                                                   self.act_scaling_factor)
                q = _fixedpoint_requant_identity(x, identity, nm_x, sh_x,
                                                 nm_i, sh_i, n, out_dtype)
        return q, jnp.float32(self.act_scaling_factor)


# ----------------------------------------------------------------------------
# NumPy references (bit-exact checks)
# ----------------------------------------------------------------------------

def _ref_symmetric(x, scale, n):
    inv = np.float32(1.0) / np.float32(scale)
    return np.clip(np.round(np.asarray(x, np.float32) * inv), -n - 1, n).astype(np.float32)


def _ref_fixedpoint(x_int, nm, shifter, r, identity_int=None, nm_i=None, shift_i=None):
    def rq(v, nm_, s_):
        tmp = np.asarray(v).astype(np.int64) * np.int64(nm_)
        bit = (tmp < 0).astype(np.int64)
        nudge = (np.int64(1) << np.int64(s_ - 1)) - bit
        return (tmp + nudge) >> np.int64(s_)
    out = rq(x_int, nm, shifter)
    if identity_int is not None:
        out = out + rq(identity_int, nm_i, shift_i)
    return np.clip(out, -r - 1, r).astype(np.int8)


# ----------------------------------------------------------------------------
# Demo
# ----------------------------------------------------------------------------

if __name__ == "__main__":
    key = jax.random.PRNGKey(0)
    k1, k2, k3 = jax.random.split(key, 3)
    B, S, H = 2, 16, 128           # rows = 32 -> clean (32, 128) int8 tile
    n8 = 2 ** 7 - 1

    # ---- Path 1: float activation -> int-valued float (SymmetricQuantAct) ----
    x = jax.random.normal(k1, (B, S, H), dtype=jnp.float32)
    qa = QuantActPallas(activation_bit=8, quant_mode=True)
    qa.x_min, qa.x_max = np.float32(-4.0), np.float32(4.0)     # simulated calibration
    q1, sf1 = qa(x)
    q1 = jax.block_until_ready(q1)
    ref1 = _ref_symmetric(np.asarray(x), qa.act_scaling_factor, n8)
    np.testing.assert_array_equal(np.asarray(q1), ref1)

    # ---- Path 2: integer requantization (FixedPointMul) with identity ----
    x_int = jax.random.randint(k2, (B, S, H), -10000, 10000, dtype=jnp.int32)
    id_int = jax.random.randint(k3, (B, S, H), -10000, 10000, dtype=jnp.int32)
    qa2 = QuantActPallas(activation_bit=8, quant_mode=True)
    qa2.x_min, qa2.x_max = np.float32(-2.0), np.float32(2.0)
    pre_sf, id_sf = np.float32(1.6e-4), np.float32(9.0e-5)
    q2, sf2 = qa2(x_int, pre_act_scaling_factor=pre_sf,
                  identity=id_int, identity_scaling_factor=id_sf)
    q2 = jax.block_until_ready(q2)
    assert q2.dtype == jnp.int8                                # downcast fused in-kernel
    nm_x, s_x = _frexp_requant_params(pre_sf, qa2.act_scaling_factor)
    nm_i, s_i = _frexp_requant_params(id_sf, qa2.act_scaling_factor)
    ref2 = _ref_fixedpoint(np.asarray(x_int), nm_x, s_x, n8,
                           np.asarray(id_int), nm_i, s_i)
    np.testing.assert_array_equal(np.asarray(q2), ref2)

    # ---- Path 2b: exercise the shift >= 32 branch, no identity ----
    qa3 = QuantActPallas(activation_bit=8, quant_mode=True)
    qa3.x_min, qa3.x_max = np.float32(-2.0), np.float32(2.0)
    pre_sf3 = np.float32(1.0e-7)
    q3, sf3 = qa3(x_int, pre_act_scaling_factor=pre_sf3)
    q3 = jax.block_until_ready(q3)
    nm3, s3 = _frexp_requant_params(pre_sf3, qa3.act_scaling_factor)
    ref3 = _ref_fixedpoint(np.asarray(x_int), nm3, s3, n8)
    np.testing.assert_array_equal(np.asarray(q3), ref3)

    # ---- quant_mode=False passthrough (identity + x) ----
    qa4 = QuantActPallas(activation_bit=8, quant_mode=False)
    y4, none_sf = qa4(x, identity=x)
    jax.block_until_ready(y4)
    assert none_sf is None
    np.testing.assert_allclose(np.asarray(y4), 2.0 * np.asarray(x), rtol=0, atol=0)

    print("KERNEL_OK")
</pallas_src>

<mosaic_0001>
module attributes {stable_mosaic.version = 11 : i64} {
  func.func @_symmetric_quant_kernel(%arg0: i32, %arg1: memref<32x128xf32, #tpu.memory_space<vmem>>, %arg2: memref<32x128xf32, #tpu.memory_space<vmem>>) attributes {dimension_semantics = [#tpu.dimension_semantics<parallel>], iteration_bounds = array<i64: 1>, scalar_prefetch = 0 : i64, scratch_operands = 0 : i64, tpu.core_type = #tpu.core_type<tc>, window_params = [{transform_indices = @transform_0, window_bounds = array<i64: 32, 128>}, {transform_indices = @transform_1, window_bounds = array<i64: 32, 128>}]} {
    %c0 = arith.constant 0 : index
    %c0_0 = arith.constant 0 : index
    %0 = vector.load %arg1[%c0, %c0_0] : memref<32x128xf32, #tpu.memory_space<vmem>>, vector<32x128xf32>
    %cst = arith.constant 3.175000e+01 : f32
    %1 = vector.broadcast %cst : f32 to vector<32x128xf32>
    %2 = arith.mulf %0, %1 : vector<32x128xf32>
    %3 = math.roundeven %2 : vector<32x128xf32>
    %cst_1 = arith.constant -1.280000e+02 : f32
    %cst_2 = arith.constant 1.270000e+02 : f32
    %4 = vector.broadcast %cst_1 : f32 to vector<32x128xf32>
    %5 = arith.maximumf %4, %3 : vector<32x128xf32>
    %6 = vector.broadcast %cst_2 : f32 to vector<32x128xf32>
    %7 = arith.minimumf %6, %5 : vector<32x128xf32>
    %c0_3 = arith.constant 0 : index
    %c0_4 = arith.constant 0 : index
    %8 = vector.load %arg2[%c0_3, %c0_4] : memref<32x128xf32, #tpu.memory_space<vmem>>, vector<32x128xf32>
    tpu.vector_store %arg2[%c0_3, %c0_4], %7 {strides = array<i32>} : memref<32x128xf32, #tpu.memory_space<vmem>>, vector<32x128xf32>,
    return
  }
  func.func @transform_0(%arg0: i32) -> (i32, i32) {
    %c0_i32 = arith.constant 0 : i32
    %c0_i32_0 = arith.constant 0 : i32
    return %arg0, %c0_i32 : i32, i32
  }
  func.func @transform_1(%arg0: i32) -> (i32, i32) {
    %c0_i32 = arith.constant 0 : i32
    %c0_i32_0 = arith.constant 0 : i32
    return %arg0, %c0_i32 : i32, i32
  }
}

</mosaic_0001>

<bundles_post_ra>
// kernel: tpu_custom_call.1
= control target key start
LH: loop header
LB: loop body
LE: loop exit
PB: predicated region body
PF: predicated region fallthrough
CT: control target
= control target key end

     0   :  { %6 = vsyncpa [#allocation3], 0  ;;  %s188_s0 = inlined_call_operand.hbm [shape: f32[32,128], index: 0, kind: input, shape index: {}]   ;;  %s189_s1 = inlined_call_operand.hbm [shape: f32[32,128], index: 1, kind: output, shape index: {}]  }
   0x1   :  { %7 = vsyncpa [#allocation4], 0  ;;  %s12_s8 = sshll.u32 %s188_s0, 4  ;;  %s156_s9 = smov [#allocation2]   ;;  %s13_s8 = int_to_ptr.hbm [resolvable:$true] %s12_s8 }
   0x2   :  { %s14_s10 = sshll.u32 %s156_s9, 4  ;;  %s157_s11 = smov 128   ;;  %s15_s10 = int_to_ptr.vmem [resolvable:$true] %s14_s10 }
   0x3   :  { %s158_s12 = smov 8  }
   0x4   :  { %20 = dma.hbm_to_vmem [thread:$0]  %s13_s8, 512, %s15_s10, [#allocation3], %s157_s11, %s157_s11, %s158_s12  }
   0x5   :  { %152 = dma.done.wait [#allocation3], 512  }
   0x6   :  { %153 = vsyncadd [#allocation3], 4294966784  ;;  %v25_v0 = vld [vmem:[#allocation2] sm:$0xff]  ;;  %v26_v1 = vld [vmem:[#allocation2 + $0x8] sm:$0xff]  ;;  %s159_s0 = smov [#allocation5]   ;;  %s55_s16 = sshll.u32 %s189_s1, 4  ;;  %s56_s16 = int_to_ptr.hbm [resolvable:$true] %s55_s16 }
   0x7   :  { %v27_v2 = vld [vmem:[#allocation2 + $0x10] sm:$0xff]  ;;  %v29_v3 = vmul.f32 31.75, %v25_v0  ;;  %v30_v4 = vmul.f32 31.75, %v26_v1  ;;  %v28_v6 = vld [vmem:[#allocation2 + $0x18] sm:$0xff]  ;;  %s53_s13 = sshll.u32 %s159_s0, 4  ;;  %s54_s13 = int_to_ptr.vmem [resolvable:$true] %s53_s13 }
   0x8   :  { %v31_v5 = vmul.f32 31.75, %v27_v2  ;;  %v32_v10 = vmul.f32 31.75, %v28_v6 }
   0x9   :  { %v68_v7 = vand.u32 2147483647, %v29_v3  ;;  %v70_v8 = vcvt.f32.s32 %v29_v3  ;;  %v76_v9 = vand.u32 2147483647, %v30_v4  ;;  %v78_v11 = vcvt.f32.s32 %v30_v4 }
   0xa   :  { %v86_v12 = vcvt.f32.s32 %v31_v5  ;;  %v73_v14 = vand.u32 2147483648, %v29_v3  ;;  %v84_v15 = vand.u32 2147483647, %v31_v5  ;;  %v81_v17 = vand.u32 2147483648, %v30_v4 }
   0xb   :  { %v71_v13 = vcvt.s32.f32 %v70_v8  ;;  %v79_v16 = vcvt.s32.f32 %v78_v11  ;;  %v89_v19 = vand.u32 2147483648, %v31_v5  ;;  %vm69_vm0 = vcmp.lt.f32.partialorder %v68_v7, 8388608.0 }
   0xc   :  { %v87_v18 = vcvt.s32.f32 %v86_v12  ;;  %vm176_vm1 = vcmp.lt.f32.partialorder %v76_v9, 8388608.0  ;;  %v94_v22 = vcvt.f32.s32 %v32_v10  ;;  %v92_v25 = vand.u32 2147483647, %v32_v10 }
   0xd   :  { %v72_v20 = vand.u32 2147483647, %v71_v13  ;;  %v80_v23 = vand.u32 2147483647, %v79_v16  ;;  %vm85_vm2 = vcmp.lt.f32.partialorder %v84_v15, 8388608.0  ;;  %v97_v28 = vand.u32 2147483648, %v32_v10 }
   0xe   :  { %v88_v24 = vand.u32 2147483647, %v87_v18  ;;  %v95_v27 = vcvt.s32.f32 %v94_v22  ;;  %vm93_vm3 = vcmp.lt.f32.partialorder %v92_v25, 8388608.0 }
   0xf   :  { %v74_v26 = vor.u32 %v73_v14, %v72_v20  ;;  %v82_v29 = vor.u32 %v81_v17, %v80_v23 }
  0x10   :  { %v90_v30 = vor.u32 %v89_v19, %v88_v24  ;;  %v96_v32 = vand.u32 2147483647, %v95_v27 }
  0x11   :  { %v75_v31 = vsel %vm69_vm0, %v74_v26, %v29_v3  ;;  %v83_v34 = vsel %vm176_vm1, %v82_v29, %v30_v4 }
  0x12   :  { %v37_v33 = vmax.f32 %v75_v31, -128.0  ;;  %v91_v35 = vsel %vm85_vm2, %v90_v30, %v31_v5  ;;  %v38_v36 = vmax.f32 %v83_v34, -128.0  ;;  %v98_v38 = vor.u32 %v97_v28, %v96_v32 }
  0x13   :  { %v39_v37 = vmax.f32 %v91_v35, -128.0 }
  0x14   :  { %v41_v39 = vmin.f32 %v37_v33, 127.0  ;;  %v42_v40 = vmin.f32 %v38_v36, 127.0  ;;  %v99_v42 = vsel %vm93_vm3, %v98_v38, %v32_v10 }
  0x15   :  { %v43_v41 = vmin.f32 %v39_v37, 127.0  ;;  %v40_v43 = vmax.f32 %v99_v42, -128.0 }
  0x16   :  { %45 = vst [vmem:[#allocation5] sm:$0xff] %v41_v39 }
  0x17   :  { %46 = vst [vmem:[#allocation5 + $0x8] sm:$0xff] %v42_v40  ;;  %v44_v44 = vmin.f32 %v40_v43, 127.0 }
  0x18   :  { %47 = vst [vmem:[#allocation5 + $0x10] sm:$0xff] %v43_v41 }
  0x19   :  { %48 = vst [vmem:[#allocation5 + $0x18] sm:$0xff] %v44_v44 }
  0x1a   :  { %61 = dma.vmem_to_hbm [thread:$0]  %s54_s13, 512, %s56_s16, [#allocation4], %s157_s11, %s157_s11, %s158_s12  }
  0x1b   :  { %154 = dma.done.wait [#allocation4], 512  }
  0x1c   :  { %155 = vsyncadd [#allocation4], 4294966784 }
  0x1d   :  { %66 = vsyncpa [#allocation3], 1 }
  0x1e   :  { %67 = vsyncpa [#allocation4], 1 }

</bundles_post_ra>
